<compile_context>
chip_gen: v6e
topology: v6e:2x2x1
jax: 0.10.0
libtpu: 0.0.40
codegen_flags: <defaults>
</compile_context>

<pallas_src>
import math
import functools

import jax
import jax.numpy as jnp
from jax.experimental import pallas as pl
from jax.experimental.pallas import tpu as pltpu


def make_positional_encoding(d_model: int, max_len: int = 5000) -> jnp.ndarray:
    """Deterministic construction of the `pe` buffer, matching the PyTorch init."""
    position = jnp.arange(max_len, dtype=jnp.float32)[:, None]            # [max_len, 1]
    div_term = jnp.exp(
        jnp.arange(0, d_model, 2, dtype=jnp.float32)
        * (-math.log(10000.0) / d_model)
    )                                                                     # [d_model//2]
    pe = jnp.zeros((max_len, d_model), dtype=jnp.float32)
    pe = pe.at[:, 0::2].set(jnp.sin(position * div_term))
    pe = pe.at[:, 1::2].set(jnp.cos(position * div_term))
    return pe


def _pos_enc_kernel(x_ref, pe_ref, o_ref, *, scale, compute_dtype):
    # x_ref : (ts, lane) tile of the flattened [S, B*D] input
    # pe_ref: (1,  lane) seq-invariant row (VMEM-resident), already compute_dtype
    x = x_ref[...].astype(compute_dtype)
    o_ref[...] = (x * scale + pe_ref[...]).astype(o_ref.dtype)


def _round_up(v: int, m: int) -> int:
    return ((v + m - 1) // m) * m


def _round_down(v: int, m: int) -> int:
    return (v // m) * m


def _choose_tiles(S: int, BD: int, itemsize: int, pack: int,
                  target_bytes: int = 2 << 20):
    """Pick (seq_tile, lane_tile).

    lane_tile is a multiple of 128 (or == BD); seq_tile is a multiple of the
    sublane pack (or == S); seq_tile*lane_tile*itemsize ~ target_bytes (the
    measured roofline knee is ~1-4 MiB/tile); >= 2 total grid blocks whenever
    the shape allows it.  Grids use cdiv, so tiles need not divide the axes.
    """
    min_ts = S if S < pack else pack
    # Lane tile first: as wide as the budget allows at the minimum seq tile.
    max_lane = max(128, target_bytes // max(min_ts * itemsize, 1))
    if BD <= 128 or BD <= max_lane:
        lane = BD
    else:
        lane = max(128, _round_down(max_lane, 128))
    # Seq tile from the remaining budget.
    ts = _round_down(max(1, target_bytes // max(lane * itemsize, 1)), pack)
    ts = max(ts, min_ts)
    if ts >= S:
        ts = S
    # Guarantee >= 2 grid blocks when possible (v7x has 2 TensorCores).
    if pl.cdiv(S, ts) * pl.cdiv(BD, lane) < 2:
        if BD > 128:
            lane = min(lane, _round_up(pl.cdiv(BD, 2), 128))
        elif S > pack:
            ts = min(ts, _round_up(pl.cdiv(S, 2), pack))
        # else: the whole problem fits in one small block; leave it alone.
    return ts, lane


def positional_encoding_forward(x: jnp.ndarray, pe: jnp.ndarray, d_model: int,
                                target_tile_bytes: int = 2 << 20) -> jnp.ndarray:
    """x: [seq_len, batch, d_model]; pe: [max_len, d_model] (float32 buffer)."""
    S, B, D = x.shape
    assert D == d_model
    if not (S == B or S == 1):
        # Same constraint PyTorch broadcasting imposes on the original module.
        raise ValueError(
            "pe[:seq_len] broadcasts against x's trailing (batch, d_model) dims; "
            f"requires seq_len == batch or seq_len == 1, got S={S}, B={B}.")
    scale = float(math.sqrt(d_model))

    # bf16 stays packed (bf16-native VALU on v6e/v7x); everything else in f32.
    compute_dtype = jnp.bfloat16 if x.dtype == jnp.bfloat16 else jnp.float32

    # pe[:S] broadcast against x's trailing (B, D) dims, exactly as PyTorch does.
    pe_bd = jnp.broadcast_to(pe[:S, :], (B, D)).astype(compute_dtype)
    # Lane-dense layout: fold (batch, d_model) into one trailing axis of B*D.
    BD = B * D
    pe_row = pe_bd.reshape(1, BD)
    x2 = x.reshape(S, BD)

    itemsize = jnp.dtype(x.dtype).itemsize
    pack = {4: 8, 2: 16, 1: 32}.get(itemsize, 8)
    ts, lane = _choose_tiles(S, BD, itemsize, pack, target_tile_bytes)
    grid = (pl.cdiv(S, ts), pl.cdiv(BD, lane))          # lane axis innermost

    # Explicit VMEM budget: 2 in + 2 out double-buffers of the data tile plus
    # the pe block (1 sublane pads to 8), with ~50% headroom.
    tile_bytes = ts * lane * itemsize
    pe_block_bytes = 8 * lane * jnp.dtype(compute_dtype).itemsize
    vmem_limit = int(min(max(1.5 * (4 * tile_bytes + 2 * pe_block_bytes), 8 << 20),
                         48 << 20))

    kernel = functools.partial(_pos_enc_kernel, scale=scale,
                               compute_dtype=compute_dtype)
    out2 = pl.pallas_call(
        kernel,
        out_shape=jax.ShapeDtypeStruct((S, BD), x.dtype),
        grid_spec=pl.GridSpec(
            grid=grid,
            in_specs=[
                pl.BlockSpec((ts, lane), lambda i, j: (i, j)),   # x tiles
                pl.BlockSpec((1, lane), lambda i, j: (0, j)),    # seq-invariant pe
            ],
            out_specs=pl.BlockSpec((ts, lane), lambda i, j: (i, j)),
        ),
        compiler_params=pltpu.CompilerParams(
            dimension_semantics=("parallel", "parallel"),
            vmem_limit_bytes=vmem_limit,
        ),
    )(x2, pe_row)

    # Dropout(p=0.0) is the identity -> nothing to do.
    # NOTE: input_output_aliases (x2 -> out2) skipped intentionally: it saves no
    # HBM bandwidth for this op and would clobber x if the caller still uses it.
    return out2.reshape(S, B, D)


if __name__ == "__main__":
    d_model = 32
    max_len = 64
    seq_len = 8
    batch = 8   # must equal seq_len to match the module's exact broadcast semantics

    pe = make_positional_encoding(d_model, max_len)

    key = jax.random.PRNGKey(0)
    x = jax.random.normal(key, (seq_len, batch, d_model), dtype=jnp.float32)

    out = positional_encoding_forward(x, pe, d_model)
    out = jax.block_until_ready(out)

    # correctness check vs. plain-JAX reference of the exact PyTorch expression
    ref = x * math.sqrt(d_model) + pe[:seq_len, :]
    assert out.shape == (seq_len, batch, d_model)
    assert jnp.allclose(out, ref, atol=1e-5, rtol=1e-5)

    print("KERNEL_OK")
</pallas_src>

<mosaic_0001>
module attributes {stable_mosaic.version = 11 : i64} {
  func.func @_pos_enc_kernel(%arg0: i32, %arg1: i32, %arg2: memref<8x128xf32, #tpu.memory_space<vmem>>, %arg3: memref<1x128xf32, #tpu.memory_space<vmem>>, %arg4: memref<8x128xf32, #tpu.memory_space<vmem>>) attributes {dimension_semantics = [#tpu.dimension_semantics<parallel>, #tpu.dimension_semantics<parallel>], iteration_bounds = array<i64: 1, 2>, scalar_prefetch = 0 : i64, scratch_operands = 0 : i64, tpu.core_type = #tpu.core_type<tc>, window_params = [{transform_indices = @transform_0, window_bounds = array<i64: 8, 128>}, {transform_indices = @transform_1, window_bounds = array<i64: 1, 128>}, {transform_indices = @transform_2, window_bounds = array<i64: 8, 128>}]} {
    %c0 = arith.constant 0 : index
    %c0_0 = arith.constant 0 : index
    %0 = vector.load %arg2[%c0, %c0_0] : memref<8x128xf32, #tpu.memory_space<vmem>>, vector<8x128xf32>
    %cst = arith.constant 5.65685415 : f32
    %1 = vector.broadcast %cst : f32 to vector<8x128xf32>
    %2 = arith.mulf %0, %1 : vector<8x128xf32>
    %c0_1 = arith.constant 0 : index
    %c0_2 = arith.constant 0 : index
    %3 = vector.load %arg3[%c0_1, %c0_2] : memref<1x128xf32, #tpu.memory_space<vmem>>, vector<1x128xf32>
    %4 = vector.broadcast %3 : vector<1x128xf32> to vector<8x128xf32>
    %5 = arith.addf %2, %4 : vector<8x128xf32>
    %c0_3 = arith.constant 0 : index
    %c0_4 = arith.constant 0 : index
    %6 = vector.load %arg4[%c0_3, %c0_4] : memref<8x128xf32, #tpu.memory_space<vmem>>, vector<8x128xf32>
    tpu.vector_store %arg4[%c0_3, %c0_4], %5 {strides = array<i32>} : memref<8x128xf32, #tpu.memory_space<vmem>>, vector<8x128xf32>,
    return
  }
  func.func @transform_0(%arg0: i32, %arg1: i32) -> (i32, i32) {
    %c0_i32 = arith.constant 0 : i32
    return %arg0, %arg1 : i32, i32
  }
  func.func @transform_1(%arg0: i32, %arg1: i32) -> (i32, i32) {
    %c0_i32 = arith.constant 0 : i32
    %c0_i32_0 = arith.constant 0 : i32
    return %c0_i32, %arg1 : i32, i32
  }
  func.func @transform_2(%arg0: i32, %arg1: i32) -> (i32, i32) {
    %c0_i32 = arith.constant 0 : i32
    return %arg0, %arg1 : i32, i32
  }
}

</mosaic_0001>

<bundles_post_ra>
// kernel: tpu_custom_call.1
= control target key start
LH: loop header
LB: loop body
LE: loop exit
PB: predicated region body
PF: predicated region fallthrough
CT: control target
= control target key end

     0   :  { %7 = vsyncpa [#allocation3], 0  ;;  %s746_s0 = inlined_call_operand.hbm [shape: f32[8,256], index: 0, kind: input, shape index: {}]   ;;  %s747_s1 = inlined_call_operand.hbm [shape: f32[1,256], index: 1, kind: input, shape index: {}]   ;;  %s748_s2 = inlined_call_operand.hbm [shape: f32[8,256], index: 2, kind: output, shape index: {}]  }
   0x1   :  { %9 = vsyncpa [#allocation3 + $0x1], 0 }
   0x2   :  { %10 = vsyncpa [#allocation6], 0 }
   0x3   :  { %12 = vsyncpa [#allocation6 + $0x1], 0 }
   0x4   :  { %13 = vsyncpa [#allocation4], 0 }
   0x5   :  { %15 = vsyncpa [#allocation4 + $0x1], 0  ;;  %s582_s9 = smov 0   ;;  %s584_s10 = smov 0  }
   0x6   :  { %s586_s11 = smov 0   ;;  %s588_s12 = smov 0  }
   0x7   :  { %s590_s13 = smov 0   ;;  %s592_s14 = smov 0  }
   0x8 LB: > { %s340_s15 = sadd.s32 4294967295, %s562_s14   ;;  %s341_s16 = sadd.s32 4294967294, %s562_s14   ;;  %s562_s14 = sphi %s592_s14, %s21_s14   ;;  %s558_s13 = sphi %s590_s13, %s760_s13   ;;  %s554_s12 = sphi %s588_s12, %s759_s12   ;;  %s550_s11 = sphi %s586_s11, %s758_s11   ;;  %s546_s10 = sphi %s584_s10, %s757_s10   ;;  %s542_s9 = sphi %s582_s9, %s756_s9  }
   0x9   : > { %s30_s17 = sadd.s32 1, %s558_s13  ;;  %s42_s18 = sadd.s32 1, %s550_s11 }
   0xa   : > { %p31_p0 = scmp.ge.s32.totalorder %s30_s17, 2  ;;  %p49_p1 = scmp.ne.s32.totalorder %s550_s11, %s546_s10 }
   0xb   : > { %p50_p2 = scmp.eq.s32.totalorder %s562_s14, 0  ;;  %p55_p3 = scmp.ne.s32.totalorder %s546_s10, %s542_s9 }
   0xc   : > { %s762_s17 = smov (%p31_p0, %s30_s17), 0  ;;  %p56_p5 = scmp.eq.s32.totalorder %s340_s15, 0 }
   0xd   : > { %p623_p4 = por %p50_p2, %p49_p1  ;;  %s38_s20 = ssub.s32 %s558_s13, %s762_s17 }
   0xe   : > { %p107_p6 = scmp.eq.s32.totalorder %s340_s15, 1  ;;  %p40_p7 = scmp.eq.s32.totalorder %s38_s20, 0 }
   0xf   : > { %p629_p8 = por %p56_p5, %p55_p3  ;;  %p113_p10 = scmp.eq.s32.totalorder %s341_s16, 1 }
  0x10   : > { %p633_p9 = por %p107_p6, %p49_p1  ;;  %p372_p13 = scmp.lt.s32.totalorder %s562_s14, 2 }
  0x11   : > { %s638_s23 = scalar_select %p40_p7, %s550_s11, %s42_s18  }
  0x12   : > { %p640_p11 = por %p113_p10, %p55_p3  ;;  %s647_s25 = sand.u32 1, %s550_s11  }
  0x13   : > { %s344_s26 = sshll.u32 %s647_s25, 3  ;;  %s345_s27 = sshll.u32 %s558_s13, 7 }
  0x14   : > { %s144_s30 = scalar_lea.hbm %s746_s0, %s345_s27  ;;  %s137_s3 = scalar_lea.vmem [#allocation2], %s344_s26 }
  0x15   : > { %s146_s4 = sshll.u32 %s137_s3, 4  ;;  %p656_p0 = pnand %p372_p13, %p623_p4  ;;  %s147_s4 = int_to_ptr.vmem [resolvable:$true] %s146_s4 }
  0x16   : > { %p347_p1 = scmp.ge.s32.totalorder %s562_s14, 1  ;;  %p168_p2 = scmp.lt.s32.totalorder %s562_s14, 3 }
  0x17   : > { %s134_s6 = scalar_lea.sflag [#allocation3], %s647_s25  ;;  %p424_p3 = pneg %p656_p0 }
  0x18   : > { %s435_s7 = scalar_lea.vmem %s147_s4, 128  ;;  %s564_s8 = smov [#allocation2]  }
  0x19   : > { %p436_p5 = scmp.ne.s32.totalorder %s147_s4, %s435_s7  ;;  %s440_s15 = sshll.u32 %s564_s8, 4  ;;  %s441_s15 = int_to_ptr.vmem [resolvable:$false] %s440_s15 }
  0x1a   : > { %s442_s16 = scalar_lea.vmem %s441_s15, 256  ;;  %p443_p4 = scmp.lt.s32.totalorder %s147_s4, %s441_s15 }
  0x1b   : > { %p438_p6 = pnand %p436_p5, %p424_p3  ;;  %p444_p10 = scmp.lt.s32.totalorder %s442_s16, %s435_s7 }
  0x1d   : > { %p439_p7 = pneg %p438_p6  ;;  %p445_p13 = por %p444_p10, %p443_p4 }
  0x1f   : > { %p446_p12 = pnand %p445_p13, %p439_p7 }
  0x21   : > { %449 = shalt.err (!%p446_p12)
}
  0x22   : > { %364 = dma.hbm_to_vmem [thread:$0]  (!%p656_p0), %s144_s30, 128, %s147_s4, %s134_s6  }
  0x23   : > { %p674_p5 = pnand %p347_p1, %p168_p2  ;;  %s346_s19 = sshll.u32 %s558_s13, 4 }
  0x24   : > { %s156_s20 = scalar_lea.vmem [#allocation5], %s647_s25  ;;  %s161_s29 = scalar_lea.hbm %s747_s1, %s346_s19 }
  0x25   : > { %s163_s26 = sshll.u32 %s156_s20, 4  ;;  %s154_s3 = scalar_lea.sflag [#allocation6], %s647_s25  ;;  %s164_s26 = int_to_ptr.vmem [resolvable:$true] %s163_s26 }
  0x26   : > { %s463_s7 = scalar_lea.vmem %s164_s26, 16  ;;  %s565_s30 = smov [#allocation5]  }
  0x27   : > { %p464_p12 = scmp.ne.s32.totalorder %s164_s26, %s463_s7  ;;  %s468_s4 = sshll.u32 %s565_s30, 4  ;;  %s469_s4 = int_to_ptr.vmem [resolvable:$false] %s468_s4 }
  0x28   : > { %s470_s6 = scalar_lea.vmem %s469_s4, 32  ;;  %p471_p1 = scmp.lt.s32.totalorder %s164_s26, %s469_s4 }
  0x29   : > { %p466_p6 = pnand %p464_p12, %p424_p3  ;;  %p472_p2 = scmp.lt.s32.totalorder %s470_s6, %s463_s7 }
  0x2b   : > { %p467_p7 = pneg %p466_p6  ;;  %p473_p4 = por %p472_p2, %p471_p1 }
  0x2d   : > { %p474_p10 = pnand %p473_p4, %p467_p7 }
  0x2f   : > { %477 = shalt.err (!%p474_p10)
}
  0x30   : > { %367 = dma.hbm_to_vmem [thread:$0]  (!%p656_p0), %s161_s29, 16, %s164_s26, %s154_s3  }
  0x31   : > { %172 = sbr.rel (%p674_p5) target bundleno = 81 (0x51), region = 28  ;;  %s692_s25 = sand.u32 (!%p674_p5), 1, %s546_s10  }
  0x32   : > { %s348_s8 = sshll.u32 (!%p674_p5), %s692_s25, 3  ;;  %s175_s15 = scalar_lea.sflag (!%p674_p5), [#allocation3], %s692_s25 }
  0x33   : > { %s178_s16 = scalar_lea.vmem (!%p674_p5), [#allocation2], %s348_s8 }
  0x36   : > { %529 = dma.done.wait (%p629_p8), %s175_s15, 128  }
  0x37   : > { %531 = vsyncadd (%p629_p8), %s175_s15, 4294967168  ;;  %s184_s5 = scalar_lea.sflag [#allocation6], %s692_s25  ;;  %s186_s18 = scalar_lea.vmem [#allocation5], %s692_s25 }
  0x38   : > { %533 = dma.done.wait (%p629_p8), %s184_s5, 16  }
  0x39   : > { %535 = vsyncadd (%p629_p8), %s184_s5, 4294967280  ;;  %v211_v0 = vld [vmem:[%s178_s16] sm:$0xff]  ;;  %s210_s19 = scalar_lea.vmem [#allocation7], %s348_s8  ;;  %s352_s26 = sshll.u32 %s554_s12, 7 }
  0x3a   : > { %v350_v1 = vld [vmem:[%s186_s18] ss:$0 sm:$0xff]  ;;  %s238_s20 = sshll.u32 %s210_s19, 4  ;;  %v212_v2 = vmul.f32 5.656854, %v211_v0  ;;  %s236_s29 = scalar_lea.hbm %s748_s2, %s352_s26  ;;  %s239_s20 = int_to_ptr.vmem [resolvable:$true] %s238_s20 }
  0x3b   : > { %s223_s3 = scalar_lea.sflag [#allocation4], %s692_s25  ;;  %s478_s7 = scalar_lea.vmem %s239_s20, 128 }
  0x3c   : > { %v220_v3 = vadd.f32 %v350_v1, %v212_v2  ;;  %p479_p0 = scmp.ne.s32.totalorder %s239_s20, %s478_s7  ;;  %s566_s21 = smov [#allocation7]  }
  0x3d   : > { %s482_s30 = sshll.u32 %s566_s21, 4  ;;  %s483_s30 = int_to_ptr.vmem [resolvable:$false] %s482_s30 }
  0x3e   : > { %221 = vst [vmem:[%s210_s19] sm:$0xff] %v220_v3  ;;  %p480_p8 = pnand %p479_p0, %p633_p9  ;;  %s484_s4 = scalar_lea.vmem %s483_s30, 256 }
  0x3f   : > { %p485_p13 = scmp.lt.s32.totalorder %s239_s20, %s483_s30  ;;  %p486_p5 = scmp.lt.s32.totalorder %s484_s4, %s478_s7 }
  0x40   : > { %p481_p3 = pneg %p480_p8 }
  0x41   : > { %p487_p12 = por %p486_p5, %p485_p13 }
  0x43   : > { %p488_p6 = pnand %p487_p12, %p481_p3 }
  0x45   : > { %491 = shalt.err (!%p488_p6)
}
  0x46   : > { %s492_s12 = scalar_lea.hbm %s236_s29, 128  ;;  %s496_s8 = scalar_lea.hbm %s748_s2, 256 }
  0x47   : > { %p493_p7 = scmp.ne.s32.totalorder %s236_s29, %s492_s12  ;;  %p497_p4 = scmp.lt.s32.totalorder %s236_s29, %s748_s2 }
  0x48   : > { %p498_p10 = scmp.lt.s32.totalorder %s496_s8, %s492_s12 }
  0x49   : > { %p494_p1 = pnand %p493_p7, %p633_p9 }
  0x4a   : > { %p499_p0 = por %p498_p10, %p497_p4 }
  0x4b   : > { %p495_p2 = pneg %p494_p1 }
  0x4d   : > { %p500_p8 = pnand %p499_p0, %p495_p2 }
  0x4f   : > { %503 = shalt.err (!%p500_p8)
}
  0x50   : > { %359 = dma.vmem_to_hbm [thread:$0]  (%p633_p9), %s239_s20, 128, %s236_s29, %s223_s3  }
  0x51 PF: > { %s250_s5 = sand.u32 1, %s542_s9   ;;  %p755_p3 = scmp.ge.s32.totalorder %s562_s14, 2 }
  0x52   : > { %s251_s18 = scalar_lea.sflag [#allocation4], %s250_s5 }
  0x53   : > { %p369_p13 = pnand %p755_p3, %p640_p11 }
  0x55   : > { %p370_p5 = pneg %p369_p13 }
  0x57   : > { %537 = dma.done.wait (%p370_p5), %s251_s18, 128  }
  0x58   : > { %539 = vsyncadd (%p370_p5), %s251_s18, 4294967168  ;;  %s21_s14 = sadd.s32 1, %s562_s14   ;;  %s756_s9 = smov %s546_s10 }
  0x59   : > { %p18_p12 = scmp.ge.s32.totalorder %s21_s14, 4   ;;  %s757_s10 = smov %s550_s11 }
  0x5a   : > { %s758_s11 = smov %s638_s23  ;;  %s759_s12 = smov %s558_s13 }
  0x5b   : > { %s760_s13 = smov %s762_s17  ;;  %20 = sbr.rel (!%p18_p12) target bundleno = 8 (0x8), region = 86 }
  0x60   :  { %256 = vsyncpa [#allocation3], 1 }
  0x61   :  { %258 = vsyncpa [#allocation3 + $0x1], 1 }
  0x62   :  { %259 = vsyncpa [#allocation6], 1 }
  0x63   :  { %261 = vsyncpa [#allocation6 + $0x1], 1 }
  0x64   :  { %262 = vsyncpa [#allocation4], 1 }
  0x65   :  { %264 = vsyncpa [#allocation4 + $0x1], 1 }

</bundles_post_ra>
